<compile_context>
chip_gen: v7x
topology: tpu7x:2x2x1
jax: 0.10.0
libtpu: 0.0.40
codegen_flags: <defaults>
</compile_context>

<pallas_src>
import functools

import jax
import jax.numpy as jnp
from jax.experimental import pallas as pl
from jax.experimental.pallas import tpu as pltpu


def _round_up(x, m):
    return ((x + m - 1) // m) * m


# ----------------------------------------------------------------------------
# Kernel 1:  H = X @ W      (hoisted out of the A_hat contraction)
# ----------------------------------------------------------------------------
def xw_kernel(x_ref, w_ref, h_ref):
    h = jnp.dot(x_ref[...], w_ref[...], preferred_element_type=jnp.float32)
    h_ref[...] = h.astype(h_ref.dtype)


def compute_xw(x_pad, w_pad, tile_rows):
    n_pad, f_in_pad = x_pad.shape
    f_out_pad = w_pad.shape[1]
    return pl.pallas_call(
        xw_kernel,
        out_shape=jax.ShapeDtypeStruct((n_pad, f_out_pad), jnp.bfloat16),
        grid=(n_pad // tile_rows,),
        in_specs=[
            pl.BlockSpec((tile_rows, f_in_pad), lambda i: (i, 0)),
            pl.BlockSpec((f_in_pad, f_out_pad), lambda i: (0, 0)),
        ],
        out_specs=pl.BlockSpec((tile_rows, f_out_pad), lambda i: (i, 0)),
        compiler_params=pltpu.CompilerParams(
            dimension_semantics=("parallel",),
        ),
    )(x_pad, w_pad)


# ----------------------------------------------------------------------------
# Kernel 2:  Y = relu(A_hat @ H + b)   (bias added AFTER propagation)
#   grid = (row tiles, reduction tiles), f32 accumulator in VMEM scratch.
# ----------------------------------------------------------------------------
def agg_kernel(a_ref, h_ref, b_ref, o_ref, acc_ref):
    k = pl.program_id(1)

    @pl.when(k == 0)
    def _():
        acc_ref[...] = jnp.zeros_like(acc_ref)

    # bf16 x bf16 -> f32 accumulate on the MXU
    acc_ref[...] += jnp.dot(a_ref[...], h_ref[...],
                            preferred_element_type=jnp.float32)

    @pl.when(k == pl.num_programs(1) - 1)
    def _():
        y = acc_ref[...] + b_ref[...]
        o_ref[...] = jnp.maximum(y, 0.0).astype(o_ref.dtype)


def aggregate(a_pad, h_pad, b_pad, tm, tk):
    n_pad = a_pad.shape[0]
    f_out_pad = h_pad.shape[1]
    flops = 2 * n_pad * n_pad * f_out_pad
    bytes_accessed = (a_pad.size * 2 + h_pad.size * 2
                      + n_pad * f_out_pad * 4 + b_pad.size * 4)
    return pl.pallas_call(
        agg_kernel,
        out_shape=jax.ShapeDtypeStruct((n_pad, f_out_pad), jnp.float32),
        grid=(n_pad // tm, n_pad // tk),
        in_specs=[
            pl.BlockSpec((tm, tk), lambda i, k: (i, k)),          # A_hat tile
            pl.BlockSpec((tk, f_out_pad), lambda i, k: (k, 0)),   # H tile
            pl.BlockSpec((1, f_out_pad), lambda i, k: (0, 0)),    # bias
        ],
        out_specs=pl.BlockSpec((tm, f_out_pad), lambda i, k: (i, 0)),
        scratch_shapes=[pltpu.VMEM((tm, f_out_pad), jnp.float32)],
        compiler_params=pltpu.CompilerParams(
            dimension_semantics=("parallel", "arbitrary"),
            vmem_limit_bytes=32 * 1024 * 1024,  # safe on v5e/v6e/v7x
        ),
        cost_estimate=pl.CostEstimate(
            flops=flops, transcendentals=0, bytes_accessed=bytes_accessed),
    )(a_pad, h_pad, b_pad)


# ----------------------------------------------------------------------------
# Glue: symmetric-normalized adjacency with self loops (GCNConv-style)
# ----------------------------------------------------------------------------
def build_norm_adj(edge_index, num_nodes):
    src = edge_index[0]
    dst = edge_index[1]
    adj = jnp.zeros((num_nodes, num_nodes), jnp.float32)
    adj = adj.at[dst, src].add(1.0)                      # accumulate multi-edges
    adj = adj + jnp.eye(num_nodes, dtype=jnp.float32)    # self loops
    deg = adj.sum(axis=1)
    d_inv_sqrt = jnp.where(deg > 0, 1.0 / jnp.sqrt(deg), 0.0)
    return d_inv_sqrt[:, None] * adj * d_inv_sqrt[None, :]


# ----------------------------------------------------------------------------
# Encoder: k graph-conv layers, each followed by the activation (ReLU).
# Mirrors the PyTorch __init__ (k+1 convs built) but the forward pass only
# uses the first k, matching the reference forward().
# ----------------------------------------------------------------------------
def init_encoder_params(key, in_channels, out_channels, k):
    params = []
    dims = [in_channels] + [out_channels] * (k + 1)
    for i in range(k + 1):
        key, wk = jax.random.split(key)
        fan_in, fan_out = dims[i], dims[i + 1]
        scale = 1.0 / jnp.sqrt(jnp.float32(fan_in))
        w = jax.random.uniform(wk, (fan_in, fan_out), jnp.float32, -scale, scale)
        b = jnp.zeros((1, fan_out), jnp.float32)
        params.append((w, b))
    return params


def encoder_forward(params, x, edge_index, k):
    if k == 0:
        return x
    n, f_in = x.shape

    # Pad node count to a multiple of 128 so all blocks are (8,128)-aligned.
    n_pad = _round_up(n, 128)
    tk = max(t for t in (128, 256, 512) if n_pad % t == 0)   # reduction tile
    tm = max(t for t in (128, 256) if n_pad % t == 0)        # row tile

    # Normalized adjacency in bf16 (halves HBM traffic of the dominant operand).
    a_hat = build_norm_adj(edge_index, n).astype(jnp.bfloat16)
    a_pad = jnp.zeros((n_pad, n_pad), jnp.bfloat16).at[:n, :n].set(a_hat)

    # Activations stay padded (rows -> n_pad, features -> multiple of 128 lanes).
    f_in_pad = _round_up(f_in, 128)
    x_pad = jnp.zeros((n_pad, f_in_pad), jnp.float32).at[:n, :f_in].set(x)

    f_out = params[0][0].shape[1]
    for i in range(k):                       # only the first k convs are applied
        w, b = params[i]
        fi, fo = w.shape
        fi_pad = _round_up(fi, 128)
        fo_pad = _round_up(fo, 128)
        w_pad = jnp.zeros((fi_pad, fo_pad), jnp.float32).at[:fi, :fo].set(w)
        b_pad = jnp.zeros((1, fo_pad), jnp.float32).at[:, :fo].set(b)

        h_pad = compute_xw(x_pad, w_pad, tile_rows=tk)   # (n_pad, fo_pad) bf16
        x_pad = aggregate(a_pad, h_pad, b_pad, tm, tk)   # (n_pad, fo_pad) f32

    return x_pad[:n, :f_out]


# ----------------------------------------------------------------------------
if __name__ == "__main__":
    key = jax.random.PRNGKey(0)
    k_layers = 2
    in_channels, out_channels = 4, 32
    num_nodes, num_edges = 8, 16

    k1, k2, k3, k4 = jax.random.split(key, 4)
    x = jax.random.normal(k1, (num_nodes, in_channels), jnp.float32)
    src = jax.random.randint(k2, (num_edges,), 0, num_nodes)
    dst = jax.random.randint(k3, (num_edges,), 0, num_nodes)
    edge_index = jnp.stack([src, dst], axis=0)  # [2, E]

    params = init_encoder_params(k4, in_channels, out_channels, k_layers)

    fwd = jax.jit(functools.partial(encoder_forward, k=k_layers))
    out = jax.block_until_ready(fwd(params, x, edge_index))
    assert out.shape == (num_nodes, out_channels)
    assert bool(jnp.all(jnp.isfinite(out)))
    print("KERNEL_OK")
</pallas_src>

<mosaic_0001>
module attributes {stable_mosaic.version = 11 : i64} {
  func.func private @main(%arg0: i32) attributes {dimension_semantics = [#tpu.dimension_semantics<core_parallel>], iteration_bounds = array<i64: 2>, tpu.core_type = #tpu.core_type<sc_scalar_subcore>, window_params = []} {
    return
  }
}

module attributes {stable_mosaic.version = 11 : i64} {
  func.func private @main(%arg0: i32) attributes {dimension_semantics = [#tpu.dimension_semantics<core_parallel>], iteration_bounds = array<i64: 2>, tpu.core_type = #tpu.core_type<sc_scalar_subcore>, window_params = []} {
    return
  }
}

module attributes {stable_mosaic.version = 11 : i64} {
  func.func @xw_kernel(%arg0: i32, %arg1: memref<128x128xf32, #tpu.memory_space<vmem>>, %arg2: memref<128x128xf32, #tpu.memory_space<vmem>>, %arg3: memref<128x128xbf16, #tpu.memory_space<vmem>>) attributes {dimension_semantics = [#tpu.dimension_semantics<parallel>], iteration_bounds = array<i64: 1>, scalar_prefetch = 0 : i64, scratch_operands = 0 : i64, tpu.core_type = #tpu.core_type<tc>, window_params = [{transform_indices = @transform_0, window_bounds = array<i64: 128, 128>}, {pipeline_mode = #tpu.pipeline_mode<synchronous>, transform_indices = @transform_1, window_bounds = array<i64: 128, 128>}, {transform_indices = @transform_2, window_bounds = array<i64: 128, 128>}]} {
    %c0 = arith.constant 0 : index
    %c0_0 = arith.constant 0 : index
    %0 = vector.load %arg1[%c0, %c0_0] : memref<128x128xf32, #tpu.memory_space<vmem>>, vector<128x128xf32>
    %c0_1 = arith.constant 0 : index
    %c0_2 = arith.constant 0 : index
    %1 = vector.load %arg2[%c0_1, %c0_2] : memref<128x128xf32, #tpu.memory_space<vmem>>, vector<128x128xf32>
    %cst = arith.constant dense<0.000000e+00> : vector<128x128xf32>
    %2 = tpu.matmul %0, %1, %cst {dimension_numbers = #tpu.dot_dimension_numbers<[1], [0], [0], [1], [0, 0, 1, 1], [], []>} : vector<128x128xf32>, vector<128x128xf32>, vector<128x128xf32> -> vector<128x128xf32>
    %3 = arith.truncf %2 : vector<128x128xf32> to vector<128x128xbf16>
    %c0_3 = arith.constant 0 : index
    %c0_4 = arith.constant 0 : index
    %4 = vector.load %arg3[%c0_3, %c0_4] : memref<128x128xbf16, #tpu.memory_space<vmem>>, vector<128x128xbf16>
    tpu.vector_store %arg3[%c0_3, %c0_4], %3 {strides = array<i32>} : memref<128x128xbf16, #tpu.memory_space<vmem>>, vector<128x128xbf16>,
    return
  }
  func.func @transform_0(%arg0: i32) -> (i32, i32) {
    %c0_i32 = arith.constant 0 : i32
    %c0_i32_0 = arith.constant 0 : i32
    return %arg0, %c0_i32 : i32, i32
  }
  func.func @transform_1(%arg0: i32) -> (i32, i32) {
    %c0_i32 = arith.constant 0 : i32
    %c0_i32_0 = arith.constant 0 : i32
    %c0_i32_1 = arith.constant 0 : i32
    return %c0_i32, %c0_i32_0 : i32, i32
  }
  func.func @transform_2(%arg0: i32) -> (i32, i32) {
    %c0_i32 = arith.constant 0 : i32
    %c0_i32_0 = arith.constant 0 : i32
    return %arg0, %c0_i32 : i32, i32
  }
}

module attributes {stable_mosaic.version = 11 : i64} {
  func.func @agg_kernel(%arg0: i32, %arg1: i32, %arg2: memref<128x128xbf16, #tpu.memory_space<vmem>>, %arg3: memref<128x128xbf16, #tpu.memory_space<vmem>>, %arg4: memref<1x128xf32, #tpu.memory_space<vmem>>, %arg5: memref<128x128xf32, #tpu.memory_space<vmem>>, %arg6: memref<128x128xf32, #tpu.memory_space<vmem>>) attributes {dimension_semantics = [#tpu.dimension_semantics<parallel>, #tpu.dimension_semantics<arbitrary>], iteration_bounds = array<i64: 1, 1>, scalar_prefetch = 0 : i64, scratch_operands = 1 : i64, tpu.core_type = #tpu.core_type<tc>, window_params = [{transform_indices = @transform_0, window_bounds = array<i64: 128, 128>}, {transform_indices = @transform_1, window_bounds = array<i64: 128, 128>}, {pipeline_mode = #tpu.pipeline_mode<synchronous>, transform_indices = @transform_2, window_bounds = array<i64: 1, 128>}, {transform_indices = @transform_3, window_bounds = array<i64: 128, 128>}]} {
    %c0_i32 = arith.constant 0 : i32
    %0 = arith.cmpi eq, %arg1, %c0_i32 : i32
    %1 = arith.extui %0 : i1 to i32
    %c0_i32_0 = arith.constant 0 : i32
    %2 = arith.cmpi ne, %1, %c0_i32_0 : i32
    scf.if %2 {
      %cst_10 = arith.constant 0.000000e+00 : f32
      %12 = vector.broadcast %cst_10 : f32 to vector<128x128xf32>
      %c0_11 = arith.constant 0 : index
      %c0_12 = arith.constant 0 : index
      %13 = vector.load %arg6[%c0_11, %c0_12] : memref<128x128xf32, #tpu.memory_space<vmem>>, vector<128x128xf32>
      tpu.vector_store %arg6[%c0_11, %c0_12], %12 {strides = array<i32>} : memref<128x128xf32, #tpu.memory_space<vmem>>, vector<128x128xf32>,
    } else {
    }
    %c0 = arith.constant 0 : index
    %c0_1 = arith.constant 0 : index
    %3 = vector.load %arg6[%c0, %c0_1] : memref<128x128xf32, #tpu.memory_space<vmem>>, vector<128x128xf32>
    %c0_2 = arith.constant 0 : index
    %c0_3 = arith.constant 0 : index
    %4 = vector.load %arg2[%c0_2, %c0_3] : memref<128x128xbf16, #tpu.memory_space<vmem>>, vector<128x128xbf16>
    %c0_4 = arith.constant 0 : index
    %c0_5 = arith.constant 0 : index
    %5 = vector.load %arg3[%c0_4, %c0_5] : memref<128x128xbf16, #tpu.memory_space<vmem>>, vector<128x128xbf16>
    %cst = arith.constant dense<0.000000e+00> : vector<128x128xf32>
    %6 = tpu.matmul %4, %5, %cst {dimension_numbers = #tpu.dot_dimension_numbers<[1], [0], [0], [1], [0, 0, 1, 1], [], []>} : vector<128x128xbf16>, vector<128x128xbf16>, vector<128x128xf32> -> vector<128x128xf32>
    %7 = arith.addf %3, %6 : vector<128x128xf32>
    %c0_6 = arith.constant 0 : index
    %c0_7 = arith.constant 0 : index
    %8 = vector.load %arg6[%c0_6, %c0_7] : memref<128x128xf32, #tpu.memory_space<vmem>>, vector<128x128xf32>
    tpu.vector_store %arg6[%c0_6, %c0_7], %7 {strides = array<i32>} : memref<128x128xf32, #tpu.memory_space<vmem>>, vector<128x128xf32>,
    %c0_i32_8 = arith.constant 0 : i32
    %9 = arith.cmpi eq, %arg1, %c0_i32_8 : i32
    %10 = arith.extui %9 : i1 to i32
    %c0_i32_9 = arith.constant 0 : i32
    %11 = arith.cmpi ne, %10, %c0_i32_9 : i32
    scf.if %11 {
      %c0_10 = arith.constant 0 : index
      %c0_11 = arith.constant 0 : index
      %12 = vector.load %arg6[%c0_10, %c0_11] : memref<128x128xf32, #tpu.memory_space<vmem>>, vector<128x128xf32>
      %c0_12 = arith.constant 0 : index
      %c0_13 = arith.constant 0 : index
      %13 = vector.load %arg4[%c0_12, %c0_13] : memref<1x128xf32, #tpu.memory_space<vmem>>, vector<1x128xf32>
      %14 = vector.broadcast %13 : vector<1x128xf32> to vector<128x128xf32>
      %15 = arith.addf %12, %14 : vector<128x128xf32>
      %cst_14 = arith.constant 0.000000e+00 : f32
      %16 = vector.broadcast %cst_14 : f32 to vector<128x128xf32>
      %17 = arith.maximumf %15, %16 : vector<128x128xf32>
      %c0_15 = arith.constant 0 : index
      %c0_16 = arith.constant 0 : index
      %18 = vector.load %arg5[%c0_15, %c0_16] : memref<128x128xf32, #tpu.memory_space<vmem>>, vector<128x128xf32>
      tpu.vector_store %arg5[%c0_15, %c0_16], %17 {strides = array<i32>} : memref<128x128xf32, #tpu.memory_space<vmem>>, vector<128x128xf32>,
    } else {
    }
    return
  }
  func.func @transform_0(%arg0: i32, %arg1: i32) -> (i32, i32) {
    %c0_i32 = arith.constant 0 : i32
    return %arg0, %arg1 : i32, i32
  }
  func.func @transform_1(%arg0: i32, %arg1: i32) -> (i32, i32) {
    %c0_i32 = arith.constant 0 : i32
    %c0_i32_0 = arith.constant 0 : i32
    return %arg1, %c0_i32 : i32, i32
  }
  func.func @transform_2(%arg0: i32, %arg1: i32) -> (i32, i32) {
    %c0_i32 = arith.constant 0 : i32
    %c0_i32_0 = arith.constant 0 : i32
    %c0_i32_1 = arith.constant 0 : i32
    return %c0_i32, %c0_i32_0 : i32, i32
  }
  func.func @transform_3(%arg0: i32, %arg1: i32) -> (i32, i32) {
    %c0_i32 = arith.constant 0 : i32
    %c0_i32_0 = arith.constant 0 : i32
    return %arg0, %c0_i32 : i32, i32
  }
}

</mosaic_0001>

<bundles_post_ra>
// kernel: encoder_forward.4
= control target key start
LH: loop header
LB: loop body
LE: loop exit
PB: predicated region body
PF: predicated region fallthrough
CT: control target
= control target key end

     0   :  { %s622_s1 = inlined_call_operand.vmem [shape: f32[128,128], index: 1, kind: input, shape index: {}]   ;;  %s623_s0 = inlined_call_operand.vmem [shape: f32[128,128], index: 0, kind: input, shape index: {}]   ;;  %s624_s2 = inlined_call_operand.vmem [shape: bf16[128,128], index: 2, kind: output, shape index: {}]  }
   0x1   :  { %v27_v0 = vld [vmem:[%s622_s1] sm:$0xff]  ;;  %v28_v1 = vld [vmem:[%s622_s1 + $0x8] sm:$0xff]  ;;  %v29_v2 = vld [vmem:[%s622_s1 + $0x10] sm:$0xff] }
   0x2   :  { %v439_v3 = vpack.c.bf16 %v28_v1, %v27_v0  ;;  %v30_v4 = vld [vmem:[%s622_s1 + $0x18] sm:$0xff]  ;;  %v31_v6 = vld [vmem:[%s622_s1 + $0x20] sm:$0xff]  ;;  %v32_v7 = vld [vmem:[%s622_s1 + $0x28] sm:$0xff] }
   0x3   :  { %v443_v5 = vpack.c.bf16 %v30_v4, %v29_v2  ;;  %v447_v8 = vpack.c.bf16 %v32_v7, %v31_v6  ;;  %v11_v9 = vld [vmem:[%s623_s0] sm:$0xff]  ;;  %v33_v11 = vld [vmem:[%s622_s1 + $0x30] sm:$0xff]  ;;  %v34_v12 = vld [vmem:[%s622_s1 + $0x38] sm:$0xff] }
   0x4   :  { %440 = vmatprep.subr.bf16.mxu0 %v439_v3  ;;  %471 = vmatprep.subr.bf16.mxu1 %v439_v3  ;;  %v19_v10 = vld [vmem:[%s623_s0 + $0x40] sm:$0xff]  ;;  %v451_v13 = vpack.c.bf16 %v34_v12, %v33_v11  ;;  %v36_v15 = vld [vmem:[%s622_s1 + $0x48] sm:$0xff]  ;;  %v37_v17 = vld [vmem:[%s622_s1 + $0x50] sm:$0xff] }
   0x5   :  { %442 = vmatpush3.bf16.msra.mxu0 %v439_v3  ;;  %479 = vmatpush3.bf16.msra.mxu1 %v439_v3  ;;  %v35_v14 = vld [vmem:[%s622_s1 + $0x40] sm:$0xff]  ;;  %v38_v18 = vld [vmem:[%s622_s1 + $0x58] sm:$0xff]  ;;  %v40_v21 = vld [vmem:[%s622_s1 + $0x68] sm:$0xff] }
   0x6   :  { %444 = vmatprep.subr.bf16.mxu0 %v443_v5  ;;  %472 = vmatprep.subr.bf16.mxu1 %v443_v5  ;;  %v455_v16 = vpack.c.bf16 %v36_v15, %v35_v14  ;;  %v459_v19 = vpack.c.bf16 %v38_v18, %v37_v17  ;;  %v39_v20 = vld [vmem:[%s622_s1 + $0x60] sm:$0xff]  ;;  %v41_v23 = vld [vmem:[%s622_s1 + $0x70] sm:$0xff]  ;;  %v42_v24 = vld [vmem:[%s622_s1 + $0x78] sm:$0xff] }
   0x7   :  { %415 = vmatprep.mubr.f32.mxu0 %v11_v9  ;;  %427 = vmatprep.mubr.f32.mxu1 %v19_v10  ;;  %v463_v22 = vpack.c.bf16 %v40_v21, %v39_v20  ;;  %v467_v25 = vpack.c.bf16 %v42_v24, %v41_v23  ;;  %v12_v26 = vld [vmem:[%s623_s0 + $0x8] sm:$0xff]  ;;  %v13_v28 = vld [vmem:[%s623_s0 + $0x10] sm:$0xff]  ;;  %v14_v30 = vld [vmem:[%s623_s0 + $0x18] sm:$0xff] }
   0x8   :  { %v20_v27 = vld [vmem:[%s623_s0 + $0x48] sm:$0xff]  ;;  %v21_v29 = vld [vmem:[%s623_s0 + $0x50] sm:$0xff]  ;;  %v22_v31 = vld [vmem:[%s623_s0 + $0x58] sm:$0xff] }
   0x9   :  { %446 = vmatpush3.bf16.msra.mxu0 %v443_v5  ;;  %480 = vmatpush3.bf16.msra.mxu1 %v443_v5  ;;  %v15_v32 = vld [vmem:[%s623_s0 + $0x20] sm:$0xff]  ;;  %v16_v34 = vld [vmem:[%s623_s0 + $0x28] sm:$0xff]  ;;  %v17_v36 = vld [vmem:[%s623_s0 + $0x30] sm:$0xff] }
   0xa   :  { %448 = vmatprep.subr.bf16.mxu0 %v447_v8  ;;  %473 = vmatprep.subr.bf16.mxu1 %v447_v8  ;;  %v23_v33 = vld [vmem:[%s623_s0 + $0x60] sm:$0xff]  ;;  %v24_v35 = vld [vmem:[%s623_s0 + $0x68] sm:$0xff]  ;;  %v25_v37 = vld [vmem:[%s623_s0 + $0x70] sm:$0xff] }
   0xb   :  { %v18_v38 = vld [vmem:[%s623_s0 + $0x38] sm:$0xff] }
   0xc   :  { %v26_v39 = vld [vmem:[%s623_s0 + $0x78] sm:$0xff] }
   0xd   :  { %450 = vmatpush3.bf16.msra.mxu0 %v447_v8  ;;  %481 = vmatpush3.bf16.msra.mxu1 %v447_v8 }
   0xe   :  { %452 = vmatprep.subr.bf16.mxu0 %v451_v13  ;;  %474 = vmatprep.subr.bf16.mxu1 %v451_v13 }
  0x11   :  { %454 = vmatpush3.bf16.msra.mxu0 %v451_v13  ;;  %482 = vmatpush3.bf16.msra.mxu1 %v451_v13 }
  0x12   :  { %456 = vmatprep.subr.bf16.mxu0 %v455_v16  ;;  %475 = vmatprep.subr.bf16.mxu1 %v455_v16 }
  0x15   :  { %458 = vmatpush3.bf16.msra.mxu0 %v455_v16  ;;  %483 = vmatpush3.bf16.msra.mxu1 %v455_v16 }
  0x16   :  { %460 = vmatprep.subr.bf16.mxu0 %v459_v19  ;;  %476 = vmatprep.subr.bf16.mxu1 %v459_v19 }
  0x19   :  { %462 = vmatpush3.bf16.msra.mxu0 %v459_v19  ;;  %484 = vmatpush3.bf16.msra.mxu1 %v459_v19 }
  0x1a   :  { %464 = vmatprep.subr.bf16.mxu0 %v463_v22  ;;  %477 = vmatprep.subr.bf16.mxu1 %v463_v22 }
  0x1d   :  { %466 = vmatpush3.bf16.msra.mxu0 %v463_v22  ;;  %485 = vmatpush3.bf16.msra.mxu1 %v463_v22 }
  0x1e   :  { %468 = vmatprep.subr.bf16.mxu0 %v467_v25  ;;  %478 = vmatprep.subr.bf16.mxu1 %v467_v25 }
  0x21   :  { %470 = vmatpush3.bf16.msra.mxu0 %v467_v25  ;;  %486 = vmatpush3.bf16.msra.mxu1 %v467_v25 }
  0x24   :  { %416 = vmatmul.mubr.f32.vlgmr.msra.gmra.mrb[0].mxu0 %v12_v26  ;;  %428 = vmatmul.mubr.f32.vlgmr.msra.gmra.mrb[0].mxu1 %v20_v27 }
  0x25   :  { %418 = vmatprep.mubr.f32.mxu0 %v13_v28  ;;  %430 = vmatprep.mubr.f32.mxu1 %v21_v29 }
  0x28   :  { %419 = vmatmul.mubr.f32.gmra.mrb[2].mxu0 %v14_v30  ;;  %431 = vmatmul.mubr.f32.gmra.mrb[2].mxu1 %v22_v31 }
  0x29   :  { %421 = vmatprep.mubr.f32.mxu0 %v15_v32  ;;  %433 = vmatprep.mubr.f32.mxu1 %v23_v33 }
  0x2c   :  { %422 = vmatmul.mubr.f32.gmra.mrb[4].mxu0 %v16_v34  ;;  %434 = vmatmul.mubr.f32.gmra.mrb[4].mxu1 %v24_v35 }
  0x2d   :  { %424 = vmatprep.mubr.f32.mxu0 %v17_v36  ;;  %436 = vmatprep.mubr.f32.mxu1 %v25_v37 }
  0x30   :  { %425 = vmatmul.mubr.f32.gmra.mrb[6].mxu0 %v18_v38  ;;  %437 = vmatmul.mubr.f32.gmra.mrb[6].mxu1 %v26_v39 }
  0xf7   :  { %v417_v40 = vpop.f32.mrb[0].mxu0  ;;  %v429_v41 = vpop.f32.mrb[0].mxu1 }
  0xf8   :  { %v109_v42 = vpop.f32.mrb[1].mxu0  ;;  %v149_v43 = vpop.f32.mrb[1].mxu1 }
  0xf9   :  { %v307_v44 = vpack.c.bf16 %v417_v40, %v109_v42  ;;  %v327_v45 = vpack.c.bf16 %v429_v41, %v149_v43 }
  0xfb   :  { %308 = vst [vmem:[%s624_s2] sm:$0xff] %v307_v44   ;;  %347 = vst [vmem:[%s624_s2 + $0x20] sm:$0xff] %v327_v45   ;;  %v420_v46 = vpop.f32.mrb[2].mxu0  ;;  %v432_v47 = vpop.f32.mrb[2].mxu1 }
  0xfc   :  { %v119_v48 = vpop.f32.mrb[3].mxu0  ;;  %v159_v49 = vpop.f32.mrb[3].mxu1 }
  0xfd   :  { %v312_v50 = vpack.c.bf16 %v420_v46, %v119_v48  ;;  %v332_v51 = vpack.c.bf16 %v432_v47, %v159_v49 }
  0xff   :  { %344 = vst [vmem:[%s624_s2 + $0x8] sm:$0xff] %v312_v50   ;;  %348 = vst [vmem:[%s624_s2 + $0x28] sm:$0xff] %v332_v51   ;;  %v423_v52 = vpop.f32.mrb[4].mxu0  ;;  %v435_v53 = vpop.f32.mrb[4].mxu1 }
 0x100   :  { %v129_v54 = vpop.f32.mrb[5].mxu0  ;;  %v169_v55 = vpop.f32.mrb[5].mxu1 }
 0x101   :  { %v317_v56 = vpack.c.bf16 %v423_v52, %v129_v54  ;;  %v337_v57 = vpack.c.bf16 %v435_v53, %v169_v55 }
 0x103   :  { %345 = vst [vmem:[%s624_s2 + $0x10] sm:$0xff] %v317_v56   ;;  %349 = vst [vmem:[%s624_s2 + $0x30] sm:$0xff] %v337_v57   ;;  %v426_v58 = vpop.f32.mrb[6].mxu0  ;;  %v438_v59 = vpop.f32.mrb[6].mxu1 }
 0x104   :  { %v139_v60 = vpop.f32.mrb[7].mxu0  ;;  %v179_v61 = vpop.f32.mrb[7].mxu1 }
 0x105   :  { %v322_v62 = vpack.c.bf16 %v426_v58, %v139_v60  ;;  %v342_v63 = vpack.c.bf16 %v438_v59, %v179_v61 }
 0x107   :  { %346 = vst [vmem:[%s624_s2 + $0x18] sm:$0xff] %v322_v62   ;;  %350 = vst [vmem:[%s624_s2 + $0x38] sm:$0xff] %v342_v63  }

// kernel: encoder_forward.5
= control target key start
LH: loop header
LB: loop body
LE: loop exit
PB: predicated region body
PF: predicated region fallthrough
CT: control target
= control target key end

     0   :  { %s602_s1 = inlined_call_operand.vmem [shape: bf16[128,128], index: 1, kind: input, shape index: {}]   ;;  %s603_s0 = inlined_call_operand.vmem [shape: bf16[128,128], index: 0, kind: input, shape index: {}]   ;;  %s604_s2 = inlined_call_operand.vmem [shape: f32[1,128], index: 2, kind: input, shape index: {}]   ;;  %s605_s3 = inlined_call_operand.vmem [shape: f32[128,128], index: 3, kind: output, shape index: {}]  }
   0x1   :  { %v467_v0 = vld [vmem:[%s602_s1] sm:$0xff]   ;;  %v468_v1 = vld [vmem:[%s602_s1 + $0x8] sm:$0xff]   ;;  %v469_v2 = vld [vmem:[%s602_s1 + $0x10] sm:$0xff]  }
   0x2   :  { %419 = vmatprep.subr.bf16.mxu0 %v467_v0  ;;  %451 = vmatprep.subr.bf16.mxu1 %v467_v0  ;;  %v470_v3 = vld [vmem:[%s602_s1 + $0x18] sm:$0xff]   ;;  %v475_v4 = vld [vmem:[%s603_s0] sm:$0xff]   ;;  %v472_v7 = vld [vmem:[%s602_s1 + $0x28] sm:$0xff]  }
   0x3   :  { %420 = vmatpush3.bf16.msra.mxu0 %v467_v0  ;;  %459 = vmatpush3.bf16.msra.mxu1 %v467_v0  ;;  %v476_v5 = vld [vmem:[%s603_s0 + $0x20] sm:$0xff]   ;;  %v473_v8 = vld [vmem:[%s602_s1 + $0x30] sm:$0xff]   ;;  %v474_v9 = vld [vmem:[%s602_s1 + $0x38] sm:$0xff]  }
   0x4   :  { %421 = vmatprep.subr.bf16.mxu0 %v468_v1  ;;  %452 = vmatprep.subr.bf16.mxu1 %v468_v1  ;;  %v471_v6 = vld [vmem:[%s602_s1 + $0x20] sm:$0xff]   ;;  %v477_v10 = vld [vmem:[%s603_s0 + $0x8] sm:$0xff]   ;;  %v479_v12 = vld [vmem:[%s603_s0 + $0x10] sm:$0xff]  }
   0x5   :  { %435 = vmatprep.mubr.bf16.mxu0 %v475_v4  ;;  %443 = vmatprep.mubr.bf16.mxu1 %v476_v5  ;;  %v478_v11 = vld [vmem:[%s603_s0 + $0x28] sm:$0xff]   ;;  %v480_v13 = vld [vmem:[%s603_s0 + $0x30] sm:$0xff]   ;;  %v481_v14 = vld [vmem:[%s603_s0 + $0x18] sm:$0xff]  }
   0x6   :  { %v482_v15 = vld [vmem:[%s603_s0 + $0x38] sm:$0xff]   ;;  %v402_v16 = vld [vmem:[%s604_s2] ss:$0 sm:$0xff] }
   0x7   :  { %422 = vmatpush3.bf16.msra.mxu0 %v468_v1  ;;  %460 = vmatpush3.bf16.msra.mxu1 %v468_v1 }
   0x8   :  { %423 = vmatprep.subr.bf16.mxu0 %v469_v2  ;;  %453 = vmatprep.subr.bf16.mxu1 %v469_v2 }
   0xb   :  { %424 = vmatpush3.bf16.msra.mxu0 %v469_v2  ;;  %461 = vmatpush3.bf16.msra.mxu1 %v469_v2 }
   0xc   :  { %425 = vmatprep.subr.bf16.mxu0 %v470_v3  ;;  %454 = vmatprep.subr.bf16.mxu1 %v470_v3 }
   0xf   :  { %426 = vmatpush3.bf16.msra.mxu0 %v470_v3  ;;  %462 = vmatpush3.bf16.msra.mxu1 %v470_v3 }
  0x10   :  { %427 = vmatprep.subr.bf16.mxu0 %v471_v6  ;;  %455 = vmatprep.subr.bf16.mxu1 %v471_v6 }
  0x13   :  { %428 = vmatpush3.bf16.msra.mxu0 %v471_v6  ;;  %463 = vmatpush3.bf16.msra.mxu1 %v471_v6 }
  0x14   :  { %429 = vmatprep.subr.bf16.mxu0 %v472_v7  ;;  %456 = vmatprep.subr.bf16.mxu1 %v472_v7 }
  0x17   :  { %430 = vmatpush3.bf16.msra.mxu0 %v472_v7  ;;  %464 = vmatpush3.bf16.msra.mxu1 %v472_v7 }
  0x18   :  { %431 = vmatprep.subr.bf16.mxu0 %v473_v8  ;;  %457 = vmatprep.subr.bf16.mxu1 %v473_v8 }
  0x1b   :  { %432 = vmatpush3.bf16.msra.mxu0 %v473_v8  ;;  %465 = vmatpush3.bf16.msra.mxu1 %v473_v8 }
  0x1c   :  { %433 = vmatprep.subr.bf16.mxu0 %v474_v9  ;;  %458 = vmatprep.subr.bf16.mxu1 %v474_v9 }
  0x1f   :  { %434 = vmatpush3.bf16.msra.mxu0 %v474_v9  ;;  %466 = vmatpush3.bf16.msra.mxu1 %v474_v9 }
  0x22   :  { %436 = vmatmul.mubr.bf16.vlgmr.msra.gmra.mrb[0].mxu0 %v477_v10  ;;  %444 = vmatmul.mubr.bf16.vlgmr.msra.gmra.mrb[0].mxu1 %v478_v11 }
  0x23   :  { %439 = vmatprep.mubr.bf16.mxu0 %v479_v12  ;;  %447 = vmatprep.mubr.bf16.mxu1 %v480_v13 }
  0x2a   :  { %440 = vmatmul.mubr.bf16.gmra.mrb[4].mxu0 %v481_v14  ;;  %448 = vmatmul.mubr.bf16.gmra.mrb[4].mxu1 %v482_v15 }
  0xf5   :  { %v437_v17 = vpop.f32.mrb[0].mxu0  ;;  %v445_v18 = vpop.f32.mrb[0].mxu1 }
  0xf6   :  { %v336_v19 = vadd.f32 %v437_v17, %v402_v16  ;;  %v344_v20 = vadd.f32 %v445_v18, %v402_v16  ;;  %v213_v21 = vpop.f32.mrb[1].mxu0  ;;  %v245_v22 = vpop.f32.mrb[1].mxu1 }
  0xf7   :  { %v334_v23 = vadd.f32 %v402_v16, %v213_v21  ;;  %v342_v24 = vadd.f32 %v402_v16, %v245_v22  ;;  %v438_v25 = vpop.f32.mrb[2].mxu0  ;;  %v446_v26 = vpop.f32.mrb[2].mxu1 }
  0xf8   :  { %v352_v27 = vmax.f32 %v336_v19, 0.0  ;;  %v360_v28 = vmax.f32 %v344_v20, 0.0  ;;  %v337_v29 = vadd.f32 %v438_v25, %v402_v16  ;;  %v345_v30 = vadd.f32 %v446_v26, %v402_v16  ;;  %v216_v31 = vpop.f32.mrb[3].mxu0  ;;  %v248_v32 = vpop.f32.mrb[3].mxu1 }
  0xf9   :  { %v350_v33 = vmax.f32 %v334_v23, 0.0  ;;  %v358_v34 = vmax.f32 %v342_v24, 0.0  ;;  %v335_v35 = vadd.f32 %v402_v16, %v216_v31  ;;  %v343_v36 = vadd.f32 %v402_v16, %v248_v32 }
  0xfa   :  { %368 = vst [vmem:[%s605_s3 + $0x10] sm:$0xff] %v352_v27  ;;  %376 = vst [vmem:[%s605_s3 + $0x50] sm:$0xff] %v360_v28  ;;  %v353_v37 = vmax.f32 %v337_v29, 0.0  ;;  %v361_v38 = vmax.f32 %v345_v30, 0.0 }
  0xfb   :  { %366 = vst [vmem:[%s605_s3] sm:$0xff] %v350_v33  ;;  %374 = vst [vmem:[%s605_s3 + $0x40] sm:$0xff] %v358_v34  ;;  %v351_v39 = vmax.f32 %v335_v35, 0.0  ;;  %v359_v40 = vmax.f32 %v343_v36, 0.0 }
  0xfc   :  { %369 = vst [vmem:[%s605_s3 + $0x18] sm:$0xff] %v353_v37  ;;  %377 = vst [vmem:[%s605_s3 + $0x58] sm:$0xff] %v361_v38 }
  0xfd   :  { %367 = vst [vmem:[%s605_s3 + $0x8] sm:$0xff] %v351_v39  ;;  %375 = vst [vmem:[%s605_s3 + $0x48] sm:$0xff] %v359_v40  ;;  %v441_v41 = vpop.f32.mrb[4].mxu0  ;;  %v449_v42 = vpop.f32.mrb[4].mxu1 }
  0xfe   :  { %v340_v43 = vadd.f32 %v441_v41, %v402_v16  ;;  %v348_v44 = vadd.f32 %v449_v42, %v402_v16  ;;  %v229_v45 = vpop.f32.mrb[5].mxu0  ;;  %v261_v46 = vpop.f32.mrb[5].mxu1 }
  0xff   :  { %v338_v47 = vadd.f32 %v402_v16, %v229_v45  ;;  %v346_v48 = vadd.f32 %v402_v16, %v261_v46  ;;  %v442_v49 = vpop.f32.mrb[6].mxu0  ;;  %v450_v50 = vpop.f32.mrb[6].mxu1 }
 0x100   :  { %v356_v51 = vmax.f32 %v340_v43, 0.0  ;;  %v364_v52 = vmax.f32 %v348_v44, 0.0  ;;  %v341_v53 = vadd.f32 %v442_v49, %v402_v16  ;;  %v349_v54 = vadd.f32 %v450_v50, %v402_v16  ;;  %v232_v55 = vpop.f32.mrb[7].mxu0  ;;  %v264_v56 = vpop.f32.mrb[7].mxu1 }
 0x101   :  { %v354_v57 = vmax.f32 %v338_v47, 0.0  ;;  %v362_v58 = vmax.f32 %v346_v48, 0.0  ;;  %v339_v59 = vadd.f32 %v402_v16, %v232_v55  ;;  %v347_v60 = vadd.f32 %v402_v16, %v264_v56 }
 0x102   :  { %372 = vst [vmem:[%s605_s3 + $0x30] sm:$0xff] %v356_v51  ;;  %380 = vst [vmem:[%s605_s3 + $0x70] sm:$0xff] %v364_v52  ;;  %v357_v61 = vmax.f32 %v341_v53, 0.0  ;;  %v365_v62 = vmax.f32 %v349_v54, 0.0 }
 0x103   :  { %370 = vst [vmem:[%s605_s3 + $0x20] sm:$0xff] %v354_v57  ;;  %378 = vst [vmem:[%s605_s3 + $0x60] sm:$0xff] %v362_v58  ;;  %v355_v63 = vmax.f32 %v339_v59, 0.0  ;;  %v363_v0 = vmax.f32 %v347_v60, 0.0 }
 0x104   :  { %373 = vst [vmem:[%s605_s3 + $0x38] sm:$0xff] %v357_v61  ;;  %381 = vst [vmem:[%s605_s3 + $0x78] sm:$0xff] %v365_v62 }
 0x105   :  { %371 = vst [vmem:[%s605_s3 + $0x28] sm:$0xff] %v355_v63  ;;  %379 = vst [vmem:[%s605_s3 + $0x68] sm:$0xff] %v363_v0 }

</bundles_post_ra>
